<compile_context>
chip_gen: v7x
topology: tpu7x:2x2x1
jax: 0.10.0
libtpu: 0.0.40
codegen_flags: <defaults>
</compile_context>

<pallas_src>
import jax
import jax.numpy as jnp
from jax.experimental import pallas as pl
from jax.experimental.pallas import tpu as pltpu


# --------------------------------------------------------------------------
# Pallas kernel
# --------------------------------------------------------------------------
def _eca_kernel(w_ref, x_ref, o_ref):
    """Fused ECA forward for one batch element.

    w_ref: (k,) f32    conv taps (SMEM)
    x_ref: (1, C, HW)  input slab, native dtype (spatial flattened onto lanes)
    o_ref: (1, C, HW)  x * sigmoid(conv1d(mean_hw(x)))
    """
    x = x_ref[0]                      # (C, HW), native dtype (no full-slab cast)
    C, HW = x.shape
    k = w_ref.shape[0]
    half = (k - 1) // 2

    # AdaptiveAvgPool2d(1): per-channel spatial mean; accumulate in f32.
    m = jnp.sum(x, axis=-1, keepdims=True, dtype=jnp.float32) * (1.0 / HW)   # (C, 1)

    # Conv1d(1, 1, k, padding=(k-1)//2, bias=False) over the channel (sublane)
    # axis == k shifted-adds on the zero-padded mean.  All work stays on a
    # single (C, 1) f32 column; no (C, C) band, no MXU.
    if half > 0:
        zpad = jnp.zeros((half, 1), jnp.float32)
        mp = jnp.concatenate([zpad, m, zpad], axis=0)      # (C + 2*half, 1)
    else:
        mp = m
    y = w_ref[0] * mp[0:C, :]
    for j in range(1, k):
        y = y + w_ref[j] * mp[j:j + C, :]                  # (C, 1) f32

    g = jax.nn.sigmoid(y)                                  # (C, 1) f32 gate

    # Broadcast the gate over the spatial (lane) axis in the input's native
    # dtype; lane-dense store.
    o_ref[0] = (x * g.astype(x.dtype)).astype(o_ref.dtype)


# --------------------------------------------------------------------------
# Wrapper
# --------------------------------------------------------------------------
def eca_forward(x, conv_w):
    """ECA forward.  x: (B, C, H, W); conv_w: Conv1d weight of shape (1, 1, k)."""
    B, C, H, W = x.shape
    HW = H * W
    k = int(conv_w.shape[-1])
    assert k % 2 == 1, "k_size must be odd (PyTorch uses padding=(k-1)//2)"

    taps = conv_w.reshape(k).astype(jnp.float32)           # (k,) -> SMEM
    x_flat = x.reshape(B, C, HW)

    # Scoped-VMEM budget: in + out blocks, double buffered, plus headroom.
    # Floor at 16 MiB (harmless everywhere), cap at v7x's 64 MiB physical VMEM.
    blk_bytes = C * HW * x.dtype.itemsize
    vmem_limit = int(min(max(4 * blk_bytes + (1 << 20), 16 << 20), 64 << 20))

    out = pl.pallas_call(
        _eca_kernel,
        out_shape=jax.ShapeDtypeStruct((B, C, HW), x.dtype),
        grid=(B,),
        in_specs=[
            # k conv taps: whole (tiny) array in scalar memory.
            pl.BlockSpec(memory_space=pltpu.MemorySpace.SMEM),
            # One batch element's (C, HW) slab per grid step.
            pl.BlockSpec((1, C, HW), lambda b: (b, 0, 0)),
        ],
        out_specs=pl.BlockSpec((1, C, HW), lambda b: (b, 0, 0)),
        compiler_params=pltpu.CompilerParams(
            dimension_semantics=("parallel",),
            vmem_limit_bytes=vmem_limit,
        ),
    )(taps, x_flat)
    return out.reshape(B, C, H, W)


# --------------------------------------------------------------------------
# Pure-JAX reference (mirrors the PyTorch graph op-for-op)
# --------------------------------------------------------------------------
def eca_reference(x, conv_w):
    B, C, H, W = x.shape
    k = conv_w.shape[-1]
    half = (k - 1) // 2
    w = conv_w.reshape(k)

    m = jnp.mean(x.astype(jnp.float32), axis=(2, 3))       # AdaptiveAvgPool2d(1)
    mp = jnp.pad(m, ((0, 0), (half, half)))                # zero pad over channels
    y = sum(w[j] * mp[:, j:j + C] for j in range(k))       # cross-correlation
    g = jax.nn.sigmoid(y)                                  # (B, C)
    return x * g[:, :, None, None].astype(x.dtype)         # broadcast over H, W


# --------------------------------------------------------------------------
if __name__ == "__main__":
    key = jax.random.PRNGKey(0)
    kx, kw = jax.random.split(key)

    # Small shapes consistent with the module: batch=2, channel=8, 16x16, k_size=3.
    B, C, H, W = 2, 8, 16, 16
    x = jax.random.normal(kx, (B, C, H, W), jnp.float32)
    conv_w = 0.5 * jax.random.normal(kw, (1, 1, 3), jnp.float32)  # Conv1d weight (no bias)

    out = eca_forward(x, conv_w)
    out = jax.block_until_ready(out)

    ref = eca_reference(x, conv_w)
    assert out.shape == x.shape
    max_err = float(jnp.max(jnp.abs(out - ref)))
    assert bool(jnp.allclose(out, ref, atol=5e-3, rtol=5e-3)), \
        f"mismatch: max abs err = {max_err}"

    print("KERNEL_OK")
</pallas_src>

<mosaic_0001>
module attributes {stable_mosaic.version = 11 : i64} {
  func.func @_eca_kernel(%arg0: i32, %arg1: memref<3xf32, #tpu.memory_space<smem>>, %arg2: memref<1x8x256xf32, #tpu.memory_space<vmem>>, %arg3: memref<1x8x256xf32, #tpu.memory_space<vmem>>) attributes {dimension_semantics = [#tpu.dimension_semantics<parallel>], iteration_bounds = array<i64: 2>, scalar_prefetch = 0 : i64, scratch_operands = 0 : i64, tpu.core_type = #tpu.core_type<tc>, window_params = [{transform_indices = @transform_0, window_bounds = array<i64: 3>}, {transform_indices = @transform_1, window_bounds = array<i64: 1, 8, 256>}, {transform_indices = @transform_2, window_bounds = array<i64: 1, 8, 256>}]} {
    %c0 = arith.constant 0 : index
    %c0_0 = arith.constant 0 : index
    %c0_1 = arith.constant 0 : index
    %0 = vector.load %arg2[%c0, %c0_0, %c0_1] : memref<1x8x256xf32, #tpu.memory_space<vmem>>, vector<1x8x256xf32>
    %1 = vector.shape_cast %0 : vector<1x8x256xf32> to vector<8x256xf32>
    %cst = arith.constant dense<0.000000e+00> : vector<8xf32>
    %2 = vector.multi_reduction <add>, %1, %cst [1] : vector<8x256xf32> to vector<8xf32>
    %3 = vector.shape_cast %2 : vector<8xf32> to vector<8x1xf32>
    %cst_2 = arith.constant 3.906250e-03 : f32
    %4 = vector.broadcast %cst_2 : f32 to vector<8x1xf32>
    %5 = arith.mulf %3, %4 : vector<8x1xf32>
    %cst_3 = arith.constant 0.000000e+00 : f32
    %6 = vector.broadcast %cst_3 : f32 to vector<1x1xf32>
    %7 = tpu.concatenate %6, %5, %6 in 0 : vector<1x1xf32>, vector<8x1xf32>, vector<1x1xf32> -> vector<10x1xf32>
    %c0_4 = arith.constant 0 : index
    %8 = memref.load %arg1[%c0_4] : memref<3xf32, #tpu.memory_space<smem>>
    %9 = vector.extract_strided_slice %7 {offsets = [0, 0], sizes = [8, 1], strides = [1, 1]} : vector<10x1xf32> to vector<8x1xf32>
    %10 = vector.broadcast %8 : f32 to vector<8x1xf32>
    %11 = arith.mulf %10, %9 : vector<8x1xf32>
    %c1 = arith.constant 1 : index
    %12 = memref.load %arg1[%c1] : memref<3xf32, #tpu.memory_space<smem>>
    %13 = vector.extract_strided_slice %7 {offsets = [1, 0], sizes = [8, 1], strides = [1, 1]} : vector<10x1xf32> to vector<8x1xf32>
    %14 = vector.broadcast %12 : f32 to vector<8x1xf32>
    %15 = arith.mulf %14, %13 : vector<8x1xf32>
    %16 = arith.addf %11, %15 : vector<8x1xf32>
    %c2 = arith.constant 2 : index
    %17 = memref.load %arg1[%c2] : memref<3xf32, #tpu.memory_space<smem>>
    %18 = vector.extract_strided_slice %7 {offsets = [2, 0], sizes = [8, 1], strides = [1, 1]} : vector<10x1xf32> to vector<8x1xf32>
    %19 = vector.broadcast %17 : f32 to vector<8x1xf32>
    %20 = arith.mulf %19, %18 : vector<8x1xf32>
    %21 = arith.addf %16, %20 : vector<8x1xf32>
    %22 = arith.negf %21 : vector<8x1xf32>
    %23 = math.exp %22 : vector<8x1xf32>
    %cst_5 = arith.constant 1.000000e+00 : f32
    %24 = vector.broadcast %cst_5 : f32 to vector<8x1xf32>
    %25 = arith.addf %24, %23 : vector<8x1xf32>
    %26 = arith.divf %24, %25 : vector<8x1xf32>
    %27 = vector.broadcast %26 : vector<8x1xf32> to vector<8x256xf32>
    %28 = arith.mulf %1, %27 : vector<8x256xf32>
    %c0_6 = arith.constant 0 : index
    %c0_7 = arith.constant 0 : index
    %c0_8 = arith.constant 0 : index
    %29 = vector.load %arg3[%c0_6, %c0_7, %c0_8] : memref<1x8x256xf32, #tpu.memory_space<vmem>>, vector<1x8x256xf32>
    %30 = vector.shape_cast %29 : vector<1x8x256xf32> to vector<8x256xf32>
    %31 = vector.shape_cast %28 : vector<8x256xf32> to vector<1x8x256xf32>
    tpu.vector_store %arg3[%c0_6, %c0_7, %c0_8], %31 {strides = array<i32>} : memref<1x8x256xf32, #tpu.memory_space<vmem>>, vector<1x8x256xf32>,
    return
  }
  func.func @transform_0(%arg0: i32) -> i32 {
    %c0_i32 = arith.constant 0 : i32
    %c0_i32_0 = arith.constant 0 : i32
    return %c0_i32 : i32
  }
  func.func @transform_1(%arg0: i32) -> (i32, i32, i32) {
    %c0_i32 = arith.constant 0 : i32
    %c0_i32_0 = arith.constant 0 : i32
    %c0_i32_1 = arith.constant 0 : i32
    return %arg0, %c0_i32, %c0_i32_0 : i32, i32, i32
  }
  func.func @transform_2(%arg0: i32) -> (i32, i32, i32) {
    %c0_i32 = arith.constant 0 : i32
    %c0_i32_0 = arith.constant 0 : i32
    %c0_i32_1 = arith.constant 0 : i32
    return %arg0, %c0_i32, %c0_i32_0 : i32, i32, i32
  }
}

</mosaic_0001>

<bundles_post_ra>
// kernel: tpu_custom_call.1
= control target key start
LH: loop header
LB: loop body
LE: loop exit
PB: predicated region body
PF: predicated region fallthrough
CT: control target
= control target key end

     0   :  { %7 = vsyncpa [#allocation5], 0  ;;  %s750_s0 = inlined_call_operand.hbm [shape: f32[3], index: 0, kind: input, shape index: {}]   ;;  %s751_s1 = inlined_call_operand.hbm [shape: f32[2,8,256], index: 1, kind: input, shape index: {}]   ;;  %s752_s2 = inlined_call_operand.hbm [shape: f32[2,8,256], index: 2, kind: output, shape index: {}]  }
   0x1   :  { %8 = vsyncpa [#allocation3], 0 }
   0x2   :  { %10 = vsyncpa [#allocation3 + $0x1], 0 }
   0x3   :  { %11 = vsyncpa [#allocation4], 0 }
   0x4   :  { %13 = vsyncpa [#allocation4 + $0x1], 0  ;;  %s541_s9 = smov 0   ;;  %s543_s10 = smov 0  }
   0x5   :  { %s545_s11 = smov 0   ;;  %s547_s12 = smov 0  }
   0x6 LB: > { %s562_s13 = sadd.s32 4294967295, %s520_s12   ;;  %s323_s14 = sadd.s32 4294967294, %s520_s12   ;;  %s520_s12 = sphi %s547_s12, %s773_s12   ;;  %s516_s11 = sphi %s545_s11, %s772_s11   ;;  %s512_s10 = sphi %s543_s10, %s771_s10   ;;  %s508_s9 = sphi %s541_s9, %s770_s9  }
   0x7   : > { %p60_p0 = scmp.ne.s32.totalorder %s512_s10, %s508_s9  ;;  %p753_p1 = scmp.eq.s32.totalorder %s562_s13, 0 }
   0x8   : > { %p90_p3 = scmp.eq.s32.totalorder %s323_s14, 1  ;;  %p324_p5 = scmp.ge.s32.totalorder %s520_s12, 1 }
   0x9   : > { %p571_p4 = por %p753_p1, %p60_p0  ;;  %p97_p7 = scmp.lt.s32.totalorder %s520_s12, 3 }
   0xa   : > { %p576_p6 = por %p90_p3, %p60_p0  ;;  %s587_s18 = sadd.s32 1, %s520_s12  }
   0xb   : > { %s756_s15 = scalar_select %p571_p4, 1, 0 }
   0xc   : > { %s757_s16 = scalar_select %p576_p6, 1, 0 }
   0xd   : > { %p581_p8 = pnand %p324_p5, %p97_p7  ;;  %s44_s19 = ssub.s32 %s520_s12, %s587_s18 }
   0xe   : > { %s47_s20 = sadd.s32 1, %s516_s11  ;;  %p600_p12 = scmp.eq.s32.totalorder %s44_s19, 0 }
   0xf   : > { %p352_p10 = pneg %p581_p8  ;;  %p54_p13 = scmp.ne.s32.totalorder %s516_s11, %s512_s10 }
  0x10   : > { %p55_p0 = scmp.eq.s32.totalorder %s520_s12, 0  ;;  %p365_p3 = scmp.lt.s32.totalorder %s520_s12, 2 }
  0x11   : > { %p596_p11 = pnand %p352_p10, %p753_p1  ;;  %s407_s25 = scalar_lea.hbm %s750_s0, 16 }
  0x12   : > { %p408_p5 = scmp.ne.s32.totalorder %s750_s0, %s407_s25  ;;  %p414_p1 = scmp.lt.u32.totalorder %s407_s25, %s750_s0 }
  0x13   : > { %p409_p7 = pneg %p596_p11 }
  0x15   : > { %p410_p10 = pnand %p409_p7, %p408_p5 }
  0x17   : > { %p411_p9 = pneg %p410_p10 }
  0x19   : > { %p416_p2 = pnand %p414_p1, %p411_p9 }
  0x1b   : > { %419 = shalt.err (!%p416_p2)
}
  0x1c   : > { %s522_s30 = smov [#allocation2]   ;;  %p56_p1 = por %p55_p0, %p54_p13 }
  0x1d   : > { %355 = dma.hbm_to_smem (!%p596_p11), %s750_s0, 16, %s522_s30, [#allocation5]  }
  0x1e   : > { %s627_s5 = scalar_select %p600_p12, %s516_s11, %s47_s20  }
  0x1f   : > { %p761_p2 = scmp.eq.s32.totalorder %s562_s13, 1  ;;  %s119_s7 = sand.u32 1, %s516_s11  }
  0x20   : > { %s342_s8 = sshll.u32 %s520_s12, 8  ;;  %s327_s14 = sshll.u32 %s119_s7, 4 }
  0x21   : > { %p639_p9 = por %p761_p2, %p54_p13  ;;  %s648_s23 = scalar_lea.hbm %s751_s1, %s342_s8 }
  0x22   : > { %s123_s20 = scalar_lea.vmem [#allocation6], %s327_s14  ;;  %p652_p11 = pnand %p365_p3, %p56_p1 }
  0x23   : > { %s762_s6 = scalar_select %p639_p9, 1, 0 }
  0x24   : > { %s131_s22 = sshll.u32 %s123_s20, 4  ;;  %s120_s25 = scalar_lea.sflag [#allocation3], %s119_s7  ;;  %s656_s22 = int_to_ptr.vmem [resolvable:$true] %s131_s22 }
  0x25   : > { %s420_s26 = scalar_lea.hbm %s648_s23, 256  ;;  %p422_p13 = pneg %p652_p11 }
  0x26   : > { %p421_p12 = scmp.ne.s32.totalorder %s648_s23, %s420_s26  ;;  %s425_s29 = scalar_lea.hbm %s751_s1, 512 }
  0x27   : > { %p426_p3 = scmp.lt.u32.totalorder %s648_s23, %s751_s1  ;;  %p427_p7 = scmp.lt.u32.totalorder %s425_s29, %s420_s26 }
  0x28   : > { %p423_p0 = pnand %p422_p13, %p421_p12  ;;  %p429_p1 = scmp.lt.u32.totalorder %s420_s26, %s648_s23 }
  0x29   : > { %p428_p10 = por %p427_p7, %p426_p3 }
  0x2a   : > { %p424_p5 = pneg %p423_p0 }
  0x2b   : > { %p430_p2 = por %p429_p1, %p428_p10 }
  0x2d   : > { %p431_p6 = pnand %p430_p2, %p424_p5 }
  0x2f   : > { %434 = shalt.err (!%p431_p6)
}
  0x30   : > { %s435_s4 = scalar_lea.vmem %s656_s22, 256  ;;  %s523_s7 = smov [#allocation6]  }
  0x31   : > { %p436_p12 = scmp.ne.s32.totalorder %s656_s22, %s435_s4  ;;  %s440_s8 = sshll.u32 %s523_s7, 4  ;;  %s441_s8 = int_to_ptr.vmem [resolvable:$false] %s440_s8 }
  0x32   : > { %s442_s14 = scalar_lea.vmem %s441_s8, 512  ;;  %p443_p4 = scmp.lt.s32.totalorder %s656_s22, %s441_s8 }
  0x33   : > { %p438_p0 = pnand %p436_p12, %p422_p13  ;;  %p444_p3 = scmp.lt.s32.totalorder %s442_s14, %s435_s4 }
  0x35   : > { %p439_p9 = pneg %p438_p0  ;;  %p445_p7 = por %p444_p3, %p443_p4 }
  0x37   : > { %p446_p10 = pnand %p445_p7, %p439_p9 }
  0x39   : > { %449 = shalt.err (!%p446_p10)
}
  0x3a   : > { %359 = dma.hbm_to_vmem [thread:$0]  (!%p652_p11), %s648_s23, 256, %s656_s22, %s120_s25  }
  0x3b   : > { %140 = sbr.rel (%p581_p8) target bundleno = 402 (0x192), region = 28  ;;  %p764_p6 = scmp.eq.s32.totalorder (!%p581_p8), %s562_s13, 0 }
  0x42   : > { %495 = dma.done.wait (%p764_p6), [#allocation5], 16   ;;  %p765_p13 = pmov %p764_p6 }
  0x43   : > { %s690_s19 = sand.u32 1, %s512_s10   ;;  %p766_p4 = scmp.ne.s32.totalorder %s756_s15, 0 }
  0x44   : > { %497 = vsyncadd (%p765_p13), [#allocation5], 4294967280  ;;  %s332_s21 = sshll.u32 %s690_s19, 4  ;;  %s147_s20 = scalar_lea.sflag [#allocation3], %s690_s19 }
  0x45   : > { %s150_s23 = scalar_lea.vmem [#allocation6], %s332_s21 }
  0x46   : > { %499 = dma.done.wait (%p766_p4), %s147_s20, 256  }
  0x47   : > { %501 = vsyncadd (%p766_p4), %s147_s20, 4294967040 }
  0x48   : > { %155 = sfence }
  0x49   : > { %v172_v0 = vld [vmem:[%s150_s23] sm:$0xff]  ;;  %v173_v1 = vld [vmem:[%s150_s23 + $0x8] sm:$0xff]  ;;  %v524_v3 = vmov 0   ;;  %s334_s17 = sld [smem:[#allocation2 + $0x1]]  ;;  %s335_s22 = sld [smem:[#allocation2 + $0x2]]  ;;  %vm181_vm0 = vcmask 1040384  }
  0x4a   : > { %v174_v2 = vadd.f32 %v173_v1, %v172_v0  ;;  %402 = vset.pattern.permute.xlu0 %v524_v3  ;;  %s184_s24 = sld [smem:[#allocation2]]  ;;  %vm193_vm1 = vcmask 1046528   ;;  %vm205_vm2 = vcmask 1045504   ;;  %s343_s15 = sshll.u32 %s562_s13, 8 }
  0x4b   : > { %s171_s25 = scalar_lea.vmem [#allocation7], %s332_s21  ;;  %s706_s29 = scalar_lea.hbm %s752_s2, %s343_s15 }
  0x4c   : > { %175 = vadd.xlane.f32.xlu0 %v174_v2  ;;  %s241_s26 = sshll.u32 %s171_s25, 4  ;;  %s227_s30 = scalar_lea.sflag [#allocation4], %s690_s19  ;;  %s708_s26 = int_to_ptr.vmem [resolvable:$true] %s241_s26 }
  0x4d   : > { %s450_s13 = scalar_lea.vmem %s708_s26, 256  ;;  %p767_p9 = scmp.ne.s32.totalorder %s762_s6, 0 }
  0x4e   : > { %p451_p8 = scmp.ne.s32.totalorder %s708_s26, %s450_s13  ;;  %s525_s3 = smov [#allocation7]  }
  0x4f   : > { %v188_v6 = vstv %s334_s17  ;;  %v200_v7 = vstv %s335_s22  ;;  %s454_s4 = sshll.u32 %s525_s3, 4  ;;  %s455_s4 = int_to_ptr.vmem [resolvable:$false] %s454_s4 }
  0x50   : > { %v185_v11 = vstv %s184_s24  ;;  %p452_p11 = pnand %p451_p8, %p767_p9  ;;  %s456_s7 = scalar_lea.vmem %s455_s4, 512 }
  0x51   : > { %p457_p1 = scmp.lt.s32.totalorder %s708_s26, %s455_s4  ;;  %p458_p2 = scmp.lt.s32.totalorder %s456_s7, %s450_s13 }
  0x52   : > { %p453_p5 = pneg %p452_p11 }
  0x53   : > { %p459_p12 = por %p458_p2, %p457_p1 }
  0x55   : > { %p460_p0 = pnand %p459_p12, %p453_p5 }
  0xd9   : > { %v176_v4 = vpop.xlane.xlu0 %175 }
  0xda   : > { %v177_v5 = vmul.f32 0.00390625, %v176_v4 }
  0xdc   : > { %v179_v8 = vrot.slane %v177_v5, 7 }
  0xde   : > { %v182_v9 = vsel %vm181_vm0, 0.0, %v179_v8  ;;  %v183_v10 = vsel %vm181_vm0, %v179_v8, 0.0 }
  0xdf   : > { %v189_v12 = vmul.f32 %v188_v6, %v182_v9  ;;  %v190_v13 = vmul.f32 %v188_v6, %v183_v10  ;;  %v201_v14 = vmul.f32 %v200_v7, %v182_v9  ;;  %v202_v15 = vmul.f32 %v200_v7, %v183_v10 }
  0xe0   : > { %v186_v19 = vmul.f32 %v185_v11, %v182_v9 }
  0xe1   : > { %v194_v16 = vrot.slane %v189_v12, 1  ;;  %v195_v17 = vrot.slane %v190_v13, 1  ;;  %v206_v18 = vrot.slane %v201_v14, 2  ;;  %v207_v20 = vrot.slane %v202_v15, 2 }
  0xe3   : > { %v196_v21 = vsel %vm193_vm1, %v194_v16, %v195_v17  ;;  %v208_v23 = vsel %vm205_vm2, %v206_v18, %v207_v20 }
  0xe4   : > { %v198_v22 = vadd.f32 %v196_v21, %v186_v19 }
  0xe6   : > { %v210_v24 = vadd.f32 %v208_v23, %v198_v22 }
  0xe8   : > { %v336_v25 = vmul.f32 -1.442695, %v210_v24 }
  0xea   : > { %403 = vpow2.f32 %v336_v25 }
  0xf4   : > { %v404_v26 = vpop.eup %403 }
  0xf5   : > { %v214_v27 = vadd.f32 1.0, %v404_v26 }
  0xf7   : > { %405 = vrcp.f32 %v214_v27 }
 0x101   : > { %v406_v28 = vpop.eup %405 }
 0x102   : > { %219 = vperm.xlu0 %402, %v406_v28  }
 0x181   : > { %v220_v29 = vpop.permute.xlu0 %219 }
 0x182   : > { %v222_v30 = vmul.f32 %v220_v29, %v172_v0  ;;  %v223_v31 = vmul.f32 %v220_v29, %v173_v1 }
 0x184   : > { %224 = vst [vmem:[%s171_s25] sm:$0xff] %v222_v30  ;;  %225 = vst [vmem:[%s171_s25 + $0x8] sm:$0xff] %v223_v31 }
 0x185   : > { %463 = shalt.err (!%p460_p0)
}
 0x186   : > { %s464_s8 = scalar_lea.hbm %s706_s29, 256  ;;  %s468_s21 = scalar_lea.hbm %s752_s2, 512 }
 0x187   : > { %p465_p3 = scmp.ne.s32.totalorder %s706_s29, %s464_s8  ;;  %p469_p6 = scmp.lt.u32.totalorder %s706_s29, %s752_s2 }
 0x188   : > { %p470_p13 = scmp.lt.u32.totalorder %s468_s21, %s464_s8  ;;  %p472_p8 = scmp.lt.u32.totalorder %s464_s8, %s706_s29 }
 0x189   : > { %p466_p7 = pnand %p465_p3, %p767_p9 }
 0x18a   : > { %p471_p4 = por %p470_p13, %p469_p6 }
 0x18b   : > { %p467_p10 = pneg %p466_p7 }
 0x18c   : > { %p473_p11 = por %p472_p8, %p471_p4 }
 0x18e   : > { %p474_p5 = pnand %p473_p11, %p467_p10 }
 0x190   : > { %477 = shalt.err (!%p474_p5)
}
 0x191   : > { %350 = dma.vmem_to_hbm [thread:$0]  (%p767_p9), %s708_s26, 256, %s706_s29, %s227_s30  }
 0x192 PF: > { %s253_s17 = sand.u32 1, %s508_s9   ;;  %p768_p1 = scmp.ne.s32.totalorder %s757_s16, 0 }
 0x193   : > { %p769_p2 = scmp.ge.s32.totalorder %s520_s12, 2  ;;  %s254_s22 = scalar_lea.sflag [#allocation4], %s253_s17 }
 0x195   : > { %p361_p12 = pnand %p769_p2, %p768_p1 }
 0x197   : > { %503 = dma.done.wait (!%p361_p12), %s254_s22, 256  }
 0x198   : > { %505 = vsyncadd (!%p361_p12), %s254_s22, 4294967040  ;;  %p16_p0 = scmp.ge.s32.totalorder %s587_s18, 4   ;;  %s770_s9 = smov %s512_s10 }
 0x199   : > { %s771_s10 = smov %s516_s11  ;;  %s772_s11 = smov %s627_s5 }
 0x19a   : > { %s773_s12 = smov %s587_s18  ;;  %18 = sbr.rel (!%p16_p0) target bundleno = 6 (0x6), region = 78 }
 0x1a1   :  { %259 = vsyncpa [#allocation3], 1 }
 0x1a2   :  { %261 = vsyncpa [#allocation3 + $0x1], 1 }
 0x1a3   :  { %262 = vsyncpa [#allocation4], 1 }
 0x1a4   :  { %264 = vsyncpa [#allocation4 + $0x1], 1 }
 0x1a5   :  { %265 = vsyncpa [#allocation5], 1 }
 0x1a6   :  { %267 = vsyncpa [#allocation5 + $0x1], 1 }

</bundles_post_ra>
